<compile_context>
chip_gen: v5e
topology: v5e:2x2
jax: 0.10.0
libtpu: 0.0.40
codegen_flags: <defaults>
</compile_context>

<pallas_src>
import jax
import jax.numpy as jnp
from jax.experimental import pallas as pl
from jax.experimental.pallas import tpu as pltpu

LANES = 128


def pack_params(params):
    """One-time packing of all weights into a single lane-dense VMEM slab."""
    emb = params["embedding"]            # (V, F)
    w_ih = params["w_ih"]                # (F, H)
    w_hh = params["w_hh"]                # (H, H)
    b = params["b"]                      # (1, H)  = b_ih + b_hh
    w_fc = params["w_fc"]                # (H, T)
    b_fc = params["b_fc"]                # (1, T)

    V, _ = emb.shape
    H = w_hh.shape[0]
    T = w_fc.shape[1]
    assert H <= LANES and T <= LANES, "single-lane-tile design"
    V_pad = ((V + LANES - 1) // LANES) * LANES

    # Hoisted input projection, computed once at pack time (off the fwd path):
    # (pad(emb) @ W_ih)[tok] == emb[tok] @ W_ih exactly.
    ew = jnp.pad(emb, ((0, V_pad - V), (0, 0))) @ w_ih       # (V_pad, H)

    def to_tile(x, rows):
        r, c = x.shape
        return jnp.pad(x, ((0, rows - r), (0, LANES - c)))

    sections = [
        ("ew",  to_tile(ew,    V_pad)),   # onehot @ ew  -> x_proj
        ("whh", to_tile(w_hh,  LANES)),   # padded so h can stay 128-wide
        ("b",   to_tile(b,     8)),
        ("wfc", to_tile(w_fc,  LANES)),
        ("bfc", to_tile(b_fc,  8)),
    ]
    offsets, blocks, rows = {}, [], 0
    for name, blk in sections:            # every section start is 8-aligned
        offsets[name] = rows
        rows += blk.shape[0]
        blocks.append(blk)
    slab = jnp.concatenate(blocks, axis=0).astype(jnp.float32)   # (rows, 128)

    dims = dict(V_pad=V_pad, H=H, T=T, offsets=offsets)
    return slab, dims


def make_forward(dims):
    """Build a jitted forward closed over the static packing layout."""
    V_pad, H, T = dims["V_pad"], dims["H"], dims["T"]
    off = dims["offsets"]

    def build_kernel(B, S):
        def kernel(tok_ref, w_ref, out_ref):
            # ---- fused embedding gather + hoisted input projection -------
            tok = tok_ref[...]                                   # (S*B, 1)
            vocab_ids = jax.lax.broadcasted_iota(jnp.int32, (S * B, V_pad), 1)
            onehot = (vocab_ids == tok).astype(jnp.float32)      # (S*B, V_pad)
            ew = w_ref[off["ew"]:off["ew"] + V_pad, :]           # (V_pad, 128)
            bvec = w_ref[off["b"]:off["b"] + 1, :]               # (1, 128)
            x_proj = (jnp.dot(onehot, ew,
                              preferred_element_type=jnp.float32)
                      + bvec)                                    # (S*B, 128)

            # ---- serial tanh recurrence: h stays vreg-resident ------------
            whh = w_ref[off["whh"]:off["whh"] + LANES, :]        # hoisted load
            h = jnp.zeros((B, LANES), jnp.float32)               # cols>=H stay 0
            for t in range(S):                                   # static unroll
                h = jnp.tanh(x_proj[t * B:(t + 1) * B, :]
                             + jnp.dot(h, whh,
                                       preferred_element_type=jnp.float32))

            # ---- lane-dense FC epilogue (unmasked 128-wide store) ---------
            wfc = w_ref[off["wfc"]:off["wfc"] + LANES, :]
            bfc = w_ref[off["bfc"]:off["bfc"] + 1, :]
            out_ref[...] = (jnp.dot(h, wfc,
                                    preferred_element_type=jnp.float32)
                            + bfc)
        return kernel

    @jax.jit
    def forward(tokens, slab):
        B, S = tokens.shape
        # Time-major flattened token ids: row s*B + b == tokens[b, s].
        # nn.Dropout(0.5) is identity in eval mode -> omitted.
        tok_tm = jnp.transpose(tokens, (1, 0)).reshape(S * B, 1).astype(jnp.int32)

        flops = (2 * S * B * V_pad * LANES          # one-hot projection
                 + 2 * S * B * LANES * LANES        # recurrence
                 + 2 * B * LANES * LANES)           # fc head
        bytes_accessed = (tok_tm.size * 4 + slab.size * 4 + B * LANES * 4)

        out = pl.pallas_call(
            build_kernel(B, S),
            out_shape=jax.ShapeDtypeStruct((B, LANES), jnp.float32),
            in_specs=[pl.BlockSpec(memory_space=pltpu.MemorySpace.VMEM),
                      pl.BlockSpec(memory_space=pltpu.MemorySpace.VMEM)],
            out_specs=pl.BlockSpec(memory_space=pltpu.MemorySpace.VMEM),
            cost_estimate=pl.CostEstimate(flops=flops,
                                          transcendentals=S * B * H,
                                          bytes_accessed=bytes_accessed),
        )(tok_tm, slab)
        return out[:, :T]

    return forward


def init_params(key, len_words, len_feature, len_hidden, typenum):
    """Deterministic synthetic parameter init (matches module __init__ shapes)."""
    k_emb, k_wih, k_whh, k_bih, k_bhh, k_wfc, k_bfc = jax.random.split(key, 7)

    # Embedding: xavier_normal_ on (len_words, len_feature)
    std_emb = (2.0 / (len_words + len_feature)) ** 0.5
    embedding = std_emb * jax.random.normal(
        k_emb, (len_words, len_feature), jnp.float32)

    # RNN: PyTorch default uniform(-1/sqrt(H), 1/sqrt(H))
    bound = 1.0 / (len_hidden ** 0.5)
    w_ih = jax.random.uniform(k_wih, (len_feature, len_hidden),
                              jnp.float32, -bound, bound)
    w_hh = jax.random.uniform(k_whh, (len_hidden, len_hidden),
                              jnp.float32, -bound, bound)
    b_ih = jax.random.uniform(k_bih, (len_hidden,), jnp.float32, -bound, bound)
    b_hh = jax.random.uniform(k_bhh, (len_hidden,), jnp.float32, -bound, bound)

    # fc: Linear(len_hidden, typenum)
    w_fc = jax.random.uniform(k_wfc, (len_hidden, typenum),
                              jnp.float32, -bound, bound)
    b_fc = jax.random.uniform(k_bfc, (typenum,), jnp.float32, -bound, bound)

    return {
        "embedding": embedding,
        "w_ih": w_ih,
        "w_hh": w_hh,
        "b": (b_ih + b_hh).reshape(1, len_hidden),
        "w_fc": w_fc,
        "b_fc": b_fc.reshape(1, typenum),
    }


if __name__ == "__main__":
    # Small shapes consistent with the module's forward.
    len_words = 100      # vocab size
    len_feature = 32     # embedding dim
    len_hidden = 32      # RNN hidden size
    typenum = 5          # output classes
    batch = 8
    seq = 8

    key = jax.random.PRNGKey(0)
    k_tok, k_par = jax.random.split(key)

    tokens = jax.random.randint(k_tok, (batch, seq), 0, len_words,
                                dtype=jnp.int32)
    params = init_params(k_par, len_words, len_feature, len_hidden, typenum)

    slab, dims = pack_params(params)          # one-time weight preprocessing
    my_rnn_forward = make_forward(dims)       # jitted forward

    logits = my_rnn_forward(tokens, slab)
    logits = jax.block_until_ready(logits)
    assert logits.shape == (batch, typenum), logits.shape

    # Pure-JAX reference for sanity check of the recurrence semantics.
    def ref_forward(tokens, p):
        x = jnp.take(p["embedding"], tokens, axis=0)     # (B, S, F)
        h = jnp.zeros((tokens.shape[0], len_hidden), jnp.float32)
        for t in range(seq):
            h = jnp.tanh(x[:, t, :] @ p["w_ih"] + h @ p["w_hh"] + p["b"])
        return h @ p["w_fc"] + p["b_fc"]

    ref = ref_forward(tokens, params)
    assert jnp.allclose(logits, ref, atol=1e-4, rtol=1e-4)

    print("KERNEL_OK")
</pallas_src>

<mosaic_0001>
module attributes {stable_mosaic.version = 11 : i64} {
  func.func @kernel(%arg0: memref<64x1xi32, #tpu.memory_space<vmem>>, %arg1: memref<400x128xf32, #tpu.memory_space<vmem>>, %arg2: memref<8x128xf32, #tpu.memory_space<vmem>>) attributes {dimension_semantics = [], scalar_prefetch = 0 : i64, scratch_operands = 0 : i64, tpu.core_type = #tpu.core_type<tc>} {
    %c0 = arith.constant 0 : index
    %c0_0 = arith.constant 0 : index
    %0 = vector.load %arg0[%c0, %c0_0] : memref<64x1xi32, #tpu.memory_space<vmem>>, vector<64x1xi32>
    %1 = tpu.iota {dimensions = array<i32: 1>} : vector<64x128xi32>
    %2 = vector.broadcast %0 : vector<64x1xi32> to vector<64x128xi32>
    %3 = arith.cmpi eq, %1, %2 : vector<64x128xi32>
    %4 = arith.extui %3 : vector<64x128xi1> to vector<64x128xi32>
    %5 = arith.sitofp %4 : vector<64x128xi32> to vector<64x128xf32>
    %c0_1 = arith.constant 0 : index
    %c0_2 = arith.constant 0 : index
    %6 = vector.load %arg1[%c0_1, %c0_2] : memref<400x128xf32, #tpu.memory_space<vmem>>, vector<128x128xf32>
    %c256 = arith.constant 256 : index
    %c0_3 = arith.constant 0 : index
    %7 = vector.load %arg1[%c256, %c0_3] : memref<400x128xf32, #tpu.memory_space<vmem>>, vector<1x128xf32>
    %cst = arith.constant dense<0.000000e+00> : vector<64x128xf32>
    %8 = tpu.matmul %5, %6, %cst {dimension_numbers = #tpu.dot_dimension_numbers<[1], [0], [0], [1], [0, 0, 1, 1], [], []>} : vector<64x128xf32>, vector<128x128xf32>, vector<64x128xf32> -> vector<64x128xf32>
    %9 = vector.broadcast %7 : vector<1x128xf32> to vector<64x128xf32>
    %10 = arith.addf %8, %9 : vector<64x128xf32>
    %c128 = arith.constant 128 : index
    %c0_4 = arith.constant 0 : index
    %11 = vector.load %arg1[%c128, %c0_4] : memref<400x128xf32, #tpu.memory_space<vmem>>, vector<128x128xf32>
    %cst_5 = arith.constant 0.000000e+00 : f32
    %12 = vector.broadcast %cst_5 : f32 to vector<8x128xf32>
    %13 = vector.extract_strided_slice %10 {offsets = [0, 0], sizes = [8, 128], strides = [1, 1]} : vector<64x128xf32> to vector<8x128xf32>
    %cst_6 = arith.constant dense<0.000000e+00> : vector<8x128xf32>
    %14 = tpu.matmul %12, %11, %cst_6 {dimension_numbers = #tpu.dot_dimension_numbers<[1], [0], [0], [1], [0, 0, 1, 1], [], []>} : vector<8x128xf32>, vector<128x128xf32>, vector<8x128xf32> -> vector<8x128xf32>
    %15 = arith.addf %13, %14 : vector<8x128xf32>
    %16 = math.tanh %15 : vector<8x128xf32>
    %17 = vector.extract_strided_slice %10 {offsets = [8, 0], sizes = [8, 128], strides = [1, 1]} : vector<64x128xf32> to vector<8x128xf32>
    %cst_7 = arith.constant dense<0.000000e+00> : vector<8x128xf32>
    %18 = tpu.matmul %16, %11, %cst_7 {dimension_numbers = #tpu.dot_dimension_numbers<[1], [0], [0], [1], [0, 0, 1, 1], [], []>} : vector<8x128xf32>, vector<128x128xf32>, vector<8x128xf32> -> vector<8x128xf32>
    %19 = arith.addf %17, %18 : vector<8x128xf32>
    %20 = math.tanh %19 : vector<8x128xf32>
    %21 = vector.extract_strided_slice %10 {offsets = [16, 0], sizes = [8, 128], strides = [1, 1]} : vector<64x128xf32> to vector<8x128xf32>
    %cst_8 = arith.constant dense<0.000000e+00> : vector<8x128xf32>
    %22 = tpu.matmul %20, %11, %cst_8 {dimension_numbers = #tpu.dot_dimension_numbers<[1], [0], [0], [1], [0, 0, 1, 1], [], []>} : vector<8x128xf32>, vector<128x128xf32>, vector<8x128xf32> -> vector<8x128xf32>
    %23 = arith.addf %21, %22 : vector<8x128xf32>
    %24 = math.tanh %23 : vector<8x128xf32>
    %25 = vector.extract_strided_slice %10 {offsets = [24, 0], sizes = [8, 128], strides = [1, 1]} : vector<64x128xf32> to vector<8x128xf32>
    %cst_9 = arith.constant dense<0.000000e+00> : vector<8x128xf32>
    %26 = tpu.matmul %24, %11, %cst_9 {dimension_numbers = #tpu.dot_dimension_numbers<[1], [0], [0], [1], [0, 0, 1, 1], [], []>} : vector<8x128xf32>, vector<128x128xf32>, vector<8x128xf32> -> vector<8x128xf32>
    %27 = arith.addf %25, %26 : vector<8x128xf32>
    %28 = math.tanh %27 : vector<8x128xf32>
    %29 = vector.extract_strided_slice %10 {offsets = [32, 0], sizes = [8, 128], strides = [1, 1]} : vector<64x128xf32> to vector<8x128xf32>
    %cst_10 = arith.constant dense<0.000000e+00> : vector<8x128xf32>
    %30 = tpu.matmul %28, %11, %cst_10 {dimension_numbers = #tpu.dot_dimension_numbers<[1], [0], [0], [1], [0, 0, 1, 1], [], []>} : vector<8x128xf32>, vector<128x128xf32>, vector<8x128xf32> -> vector<8x128xf32>
    %31 = arith.addf %29, %30 : vector<8x128xf32>
    %32 = math.tanh %31 : vector<8x128xf32>
    %33 = vector.extract_strided_slice %10 {offsets = [40, 0], sizes = [8, 128], strides = [1, 1]} : vector<64x128xf32> to vector<8x128xf32>
    %cst_11 = arith.constant dense<0.000000e+00> : vector<8x128xf32>
    %34 = tpu.matmul %32, %11, %cst_11 {dimension_numbers = #tpu.dot_dimension_numbers<[1], [0], [0], [1], [0, 0, 1, 1], [], []>} : vector<8x128xf32>, vector<128x128xf32>, vector<8x128xf32> -> vector<8x128xf32>
    %35 = arith.addf %33, %34 : vector<8x128xf32>
    %36 = math.tanh %35 : vector<8x128xf32>
    %37 = vector.extract_strided_slice %10 {offsets = [48, 0], sizes = [8, 128], strides = [1, 1]} : vector<64x128xf32> to vector<8x128xf32>
    %cst_12 = arith.constant dense<0.000000e+00> : vector<8x128xf32>
    %38 = tpu.matmul %36, %11, %cst_12 {dimension_numbers = #tpu.dot_dimension_numbers<[1], [0], [0], [1], [0, 0, 1, 1], [], []>} : vector<8x128xf32>, vector<128x128xf32>, vector<8x128xf32> -> vector<8x128xf32>
    %39 = arith.addf %37, %38 : vector<8x128xf32>
    %40 = math.tanh %39 : vector<8x128xf32>
    %41 = vector.extract_strided_slice %10 {offsets = [56, 0], sizes = [8, 128], strides = [1, 1]} : vector<64x128xf32> to vector<8x128xf32>
    %cst_13 = arith.constant dense<0.000000e+00> : vector<8x128xf32>
    %42 = tpu.matmul %40, %11, %cst_13 {dimension_numbers = #tpu.dot_dimension_numbers<[1], [0], [0], [1], [0, 0, 1, 1], [], []>} : vector<8x128xf32>, vector<128x128xf32>, vector<8x128xf32> -> vector<8x128xf32>
    %43 = arith.addf %41, %42 : vector<8x128xf32>
    %44 = math.tanh %43 : vector<8x128xf32>
    %c264 = arith.constant 264 : index
    %c0_14 = arith.constant 0 : index
    %45 = vector.load %arg1[%c264, %c0_14] : memref<400x128xf32, #tpu.memory_space<vmem>>, vector<128x128xf32>
    %c392 = arith.constant 392 : index
    %c0_15 = arith.constant 0 : index
    %46 = vector.load %arg1[%c392, %c0_15] : memref<400x128xf32, #tpu.memory_space<vmem>>, vector<1x128xf32>
    %cst_16 = arith.constant dense<0.000000e+00> : vector<8x128xf32>
    %47 = tpu.matmul %44, %45, %cst_16 {dimension_numbers = #tpu.dot_dimension_numbers<[1], [0], [0], [1], [0, 0, 1, 1], [], []>} : vector<8x128xf32>, vector<128x128xf32>, vector<8x128xf32> -> vector<8x128xf32>
    %48 = vector.broadcast %46 : vector<1x128xf32> to vector<8x128xf32>
    %49 = arith.addf %47, %48 : vector<8x128xf32>
    %c0_17 = arith.constant 0 : index
    %c0_18 = arith.constant 0 : index
    %50 = vector.load %arg2[%c0_17, %c0_18] : memref<8x128xf32, #tpu.memory_space<vmem>>, vector<8x128xf32>
    tpu.vector_store %arg2[%c0_17, %c0_18], %49 {strides = array<i32>} : memref<8x128xf32, #tpu.memory_space<vmem>>, vector<8x128xf32>,
    return
  }
}

</mosaic_0001>

<bundles_post_ra>
// kernel: forward.1
= control target key start
LH: loop header
LB: loop body
LE: loop exit
PB: predicated region body
PF: predicated region fallthrough
CT: control target
= control target key end

     0   :  { %7 = vsyncpa [#allocation3], 0  ;;  %s721_s0 = inlined_call_operand.vmem [shape: s32[64,1], index: 0, kind: input, shape index: {}]   ;;  %s722_s1 = inlined_call_operand.hbm [shape: f32[400,128], index: 1, kind: input, shape index: {}]   ;;  %s723_s2 = inlined_call_operand.hbm [shape: f32[8,128], index: 2, kind: output, shape index: {}]  }
   0x1   :  { %8 = vsyncpa [#allocation4], 0  ;;  %s15_s11 = sshll.u32 %s722_s1, 4  ;;  %s489_s12 = smov [#allocation2]   ;;  %s16_s11 = int_to_ptr.hbm [resolvable:$true] %s15_s11 }
   0x2   :  { %s17_s13 = sshll.u32 %s489_s12, 4  ;;  %s490_s14 = smov 128   ;;  %s18_s13 = int_to_ptr.vmem [resolvable:$true] %s17_s13 }
   0x3   :  { %s491_s15 = smov 8  }
   0x4   :  { %23 = dma.hbm_to_vmem [thread:$0]  %s16_s11, 6400, %s18_s13, [#allocation3], %s490_s14, %s490_s14, %s491_s15  }
   0x5   :  { %485 = dma.done.wait [#allocation3], 6400  }
   0x6   :  { %486 = vsyncadd [#allocation3], 4294960896  ;;  %v492_v0 = vmov 0   ;;  %v28_v1 = vld [vmem:[%s721_s0] sm:$0xff]  ;;  %v30_v2 = vld [vmem:[%s721_s0 + $0x10] sm:$0xff]  ;;  %v493_v40 = vmov 0.0   ;;  %v36_v41 = vlaneseq }
   0x7   :  { %416 = vset.pattern.permute.xlu0 %v492_v0  ;;  %417 = vset.pattern.permute.xlu1 %v492_v0  ;;  %v32_v3 = vld [vmem:[%s721_s0 + $0x20] sm:$0xff]  ;;  %v101_v4 = vld [vmem:[#allocation2 + $0x78] sm:$0xff]  ;;  %v100_v5 = vld [vmem:[#allocation2 + $0x70] sm:$0xff]  ;;  %v494_v44 = vmov 1.0   ;;  %s383_s6 = sshll.u32 %s723_s2, 4  ;;  %s384_s6 = int_to_ptr.hbm [resolvable:$true] %s383_s6 }
   0x8   :  { %418 = vset.pattern.permute.xlu2 %v492_v0  ;;  %39 = vperm.xlu0 %416, %v28_v1   ;;  %v523_v6 = vld [vmem:[#allocation2 + $0xf8] sm:$0xff]  ;;  %v525_v7 = vld [vmem:[#allocation2 + $0xf0] sm:$0xff]  ;;  %v99_v8 = vld [vmem:[#allocation2 + $0x68] sm:$0xff]  ;;  %v663_v42 = vand.u32 127, %v36_v41 }
   0x9   :  { %45 = vperm.xlu1 %417, %v30_v2   ;;  %51 = vperm.xlu2 %418, %v32_v3   ;;  %v529_v9 = vld [vmem:[#allocation2 + $0xe8] sm:$0xff]  ;;  %v31_v11 = vld [vmem:[%s721_s0 + $0x18] sm:$0xff]  ;;  %v98_v13 = vld [vmem:[#allocation2 + $0x60] sm:$0xff] }
   0xa   :  { %104 = vmatpush.msra.mxu0 %v101_v4  ;;  %161 = vmatpush.msra.mxu1 %v523_v6  ;;  %v29_v10 = vld [vmem:[%s721_s0 + $0x8] sm:$0xff]  ;;  %v545_v14 = vld [vmem:[#allocation2 + $0xe0] sm:$0xff]  ;;  %v97_v15 = vld [vmem:[#allocation2 + $0x58] sm:$0xff] }
   0xb   :  { %183 = vmatpush.msra.mxu2 %v523_v6  ;;  %205 = vmatpush.msra.mxu3 %v523_v6  ;;  %v33_v12 = vld [vmem:[%s721_s0 + $0x28] sm:$0xff]  ;;  %v548_v16 = vld [vmem:[#allocation2 + $0xd8] sm:$0xff]  ;;  %v96_v17 = vld [vmem:[#allocation2 + $0x50] sm:$0xff] }
   0xc   :  { %105 = vmatpush.msra.mxu0 %v100_v5  ;;  %162 = vmatpush.msra.mxu1 %v525_v7  ;;  %v552_v18 = vld [vmem:[#allocation2 + $0xd0] sm:$0xff]  ;;  %v95_v19 = vld [vmem:[#allocation2 + $0x48] sm:$0xff]  ;;  %v94_v22 = vld [vmem:[#allocation2 + $0x40] sm:$0xff] }
   0xd   :  { %184 = vmatpush.msra.mxu2 %v525_v7  ;;  %206 = vmatpush.msra.mxu3 %v525_v7  ;;  %v34_v20 = vld [vmem:[%s721_s0 + $0x30] sm:$0xff]  ;;  %v560_v21 = vld [vmem:[#allocation2 + $0xc8] sm:$0xff]  ;;  %v565_v23 = vld [vmem:[#allocation2 + $0xc0] sm:$0xff] }
   0xe   :  { %106 = vmatpush.msra.mxu0 %v99_v8  ;;  %163 = vmatpush.msra.mxu1 %v529_v9  ;;  %v93_v24 = vld [vmem:[#allocation2 + $0x38] sm:$0xff]  ;;  %v92_v26 = vld [vmem:[#allocation2 + $0x30] sm:$0xff]  ;;  %v91_v28 = vld [vmem:[#allocation2 + $0x28] sm:$0xff] }
   0xf   :  { %185 = vmatpush.msra.mxu2 %v529_v9  ;;  %207 = vmatpush.msra.mxu3 %v529_v9  ;;  %v569_v25 = vld [vmem:[#allocation2 + $0xb8] sm:$0xff]  ;;  %v574_v27 = vld [vmem:[#allocation2 + $0xb0] sm:$0xff]  ;;  %v579_v29 = vld [vmem:[#allocation2 + $0xa8] sm:$0xff] }
  0x10   :  { %42 = vperm.xlu0 %416, %v29_v10   ;;  %107 = vmatpush.msra.mxu0 %v98_v13  ;;  %v90_v30 = vld [vmem:[#allocation2 + $0x20] sm:$0xff]  ;;  %v89_v32 = vld [vmem:[#allocation2 + $0x18] sm:$0xff]  ;;  %v88_v34 = vld [vmem:[#allocation2 + $0x10] sm:$0xff] }
  0x11   :  { %48 = vperm.xlu1 %417, %v31_v11   ;;  %54 = vperm.xlu2 %418, %v33_v12   ;;  %v584_v31 = vld [vmem:[#allocation2 + $0xa0] sm:$0xff]  ;;  %v589_v33 = vld [vmem:[#allocation2 + $0x98] sm:$0xff]  ;;  %v594_v35 = vld [vmem:[#allocation2 + $0x90] sm:$0xff] }
  0x12   :  { %164 = vmatpush.msra.mxu1 %v545_v14  ;;  %186 = vmatpush.msra.mxu2 %v545_v14  ;;  %v87_v36 = vld [vmem:[#allocation2 + $0x8] sm:$0xff]  ;;  %v86_v37 = vld [vmem:[#allocation2] sm:$0xff]  ;;  %v35_v56 = vld [vmem:[%s721_s0 + $0x38] sm:$0xff]  ;;  %s495_s0 = smov [#allocation5]  }
  0x13   :  { %108 = vmatpush.msra.mxu0 %v97_v15  ;;  %208 = vmatpush.msra.mxu3 %v545_v14  ;;  %v605_v38 = vld [vmem:[#allocation2 + $0x88] sm:$0xff]  ;;  %v608_v39 = vld [vmem:[#allocation2 + $0x80] sm:$0xff]  ;;  %s381_s3 = sshll.u32 %s495_s0, 4  ;;  %s382_s3 = int_to_ptr.vmem [resolvable:$true] %s381_s3 }
  0x14   :  { %165 = vmatpush.msra.mxu1 %v548_v16  ;;  %187 = vmatpush.msra.mxu2 %v548_v16  ;;  %v704_v51 = vld [vmem:[#allocation2 + $0x100] ss:$0 sm:$0xff]  ;;  %v337_v41 = vld [vmem:[#allocation2 + $0x108] sm:$0xff] }
  0x15   :  { %109 = vmatpush.msra.mxu0 %v96_v17  ;;  %209 = vmatpush.msra.mxu3 %v548_v16 }
  0x16   :  { %166 = vmatpush.msra.mxu1 %v552_v18  ;;  %188 = vmatpush.msra.mxu2 %v552_v18 }
  0x17   :  { %110 = vmatpush.msra.mxu0 %v95_v19  ;;  %210 = vmatpush.msra.mxu3 %v552_v18 }
  0x18   :  { %57 = vperm.xlu0 %416, %v34_v20   ;;  %167 = vmatpush.msra.mxu1 %v560_v21  ;;  %v352_v20 = vld [vmem:[#allocation2 + $0x180] sm:$0xff] }
  0x19   :  { %111 = vmatpush.msra.mxu0 %v94_v22  ;;  %189 = vmatpush.msra.mxu2 %v560_v21  ;;  %v350_v22 = vld [vmem:[#allocation2 + $0x170] sm:$0xff] }
  0x1a   :  { %168 = vmatpush.msra.mxu1 %v565_v23  ;;  %211 = vmatpush.msra.mxu3 %v560_v21 }
  0x1b   :  { %112 = vmatpush.msra.mxu0 %v93_v24  ;;  %190 = vmatpush.msra.mxu2 %v565_v23 }
  0x1c   :  { %169 = vmatpush.msra.mxu1 %v569_v25  ;;  %212 = vmatpush.msra.mxu3 %v565_v23 }
  0x1d   :  { %113 = vmatpush.msra.mxu0 %v92_v26  ;;  %191 = vmatpush.msra.mxu2 %v569_v25  ;;  %v347_v26 = vld [vmem:[#allocation2 + $0x158] sm:$0xff] }
  0x1e   :  { %170 = vmatpush.msra.mxu1 %v574_v27  ;;  %213 = vmatpush.msra.mxu3 %v569_v25 }
  0x1f   :  { %114 = vmatpush.msra.mxu0 %v91_v28  ;;  %192 = vmatpush.msra.mxu2 %v574_v27  ;;  %v345_v28 = vld [vmem:[#allocation2 + $0x148] sm:$0xff] }
  0x20   :  { %171 = vmatpush.msra.mxu1 %v579_v29  ;;  %214 = vmatpush.msra.mxu3 %v574_v27 }
  0x21   :  { %115 = vmatpush.msra.mxu0 %v90_v30  ;;  %193 = vmatpush.msra.mxu2 %v579_v29  ;;  %v344_v30 = vld [vmem:[#allocation2 + $0x140] sm:$0xff] }
  0x22   :  { %172 = vmatpush.msra.mxu1 %v584_v31  ;;  %215 = vmatpush.msra.mxu3 %v579_v29 }
  0x23   :  { %116 = vmatpush.msra.mxu0 %v89_v32  ;;  %194 = vmatpush.msra.mxu2 %v584_v31  ;;  %v342_v32 = vld [vmem:[#allocation2 + $0x130] sm:$0xff] }
  0x24   :  { %173 = vmatpush.msra.mxu1 %v589_v33  ;;  %216 = vmatpush.msra.mxu3 %v584_v31 }
  0x25   :  { %117 = vmatpush.msra.mxu0 %v88_v34  ;;  %195 = vmatpush.msra.mxu2 %v589_v33 }
  0x26   :  { %174 = vmatpush.msra.mxu1 %v594_v35  ;;  %217 = vmatpush.msra.mxu3 %v589_v33 }
  0x27   :  { %118 = vmatpush.msra.mxu0 %v87_v36  ;;  %196 = vmatpush.msra.mxu2 %v594_v35 }
  0x28   :  { %218 = vmatpush.msra.mxu3 %v594_v35  ;;  %175 = vmatpush.msra.mxu1 %v605_v38 }
  0x29   :  { %119 = vmatpush.msra.mxu0 %v86_v37  ;;  %197 = vmatpush.msra.mxu2 %v605_v38  ;;  %v341_v37 = vld [vmem:[#allocation2 + $0x128] sm:$0xff] }
  0x2a   :  { %219 = vmatpush.msra.mxu3 %v605_v38  ;;  %176 = vmatpush.msra.mxu1 %v608_v39 }
  0x2b   :  { %293 = vmatpush.msrb.mxu0 %v523_v6  ;;  %177 = vmatmul.f32.vlgmr.msra.gmra.mxu1 %v493_v40  ;;  %v338_v40 = vld [vmem:[#allocation2 + $0x110] sm:$0xff] }
  0x2c   :  { %198 = vmatpush.msra.mxu2 %v608_v39  ;;  %220 = vmatpush.msra.mxu3 %v608_v39 }
  0x2d   :  { %227 = vmatpush.msrb.mxu1 %v523_v6  ;;  %294 = vmatpush.msrb.mxu0 %v525_v7 }
  0x2e   :  { %249 = vmatpush.msrb.mxu2 %v523_v6  ;;  %271 = vmatpush.msrb.mxu3 %v523_v6 }
  0x2f   :  { %228 = vmatpush.msrb.mxu1 %v525_v7  ;;  %295 = vmatpush.msrb.mxu0 %v529_v9 }
  0x30   :  { %250 = vmatpush.msrb.mxu2 %v525_v7  ;;  %272 = vmatpush.msrb.mxu3 %v525_v7 }
  0x31   :  { %229 = vmatpush.msrb.mxu1 %v529_v9  ;;  %296 = vmatpush.msrb.mxu0 %v545_v14 }
  0x32   :  { %251 = vmatpush.msrb.mxu2 %v529_v9  ;;  %273 = vmatpush.msrb.mxu3 %v529_v9 }
  0x33   :  { %230 = vmatpush.msrb.mxu1 %v545_v14  ;;  %297 = vmatpush.msrb.mxu0 %v548_v16 }
  0x34   :  { %252 = vmatpush.msrb.mxu2 %v545_v14  ;;  %274 = vmatpush.msrb.mxu3 %v545_v14 }
  0x35   :  { %231 = vmatpush.msrb.mxu1 %v548_v16  ;;  %298 = vmatpush.msrb.mxu0 %v552_v18 }
  0x36   :  { %253 = vmatpush.msrb.mxu2 %v548_v16  ;;  %275 = vmatpush.msrb.mxu3 %v548_v16 }
  0x37   :  { %232 = vmatpush.msrb.mxu1 %v552_v18  ;;  %299 = vmatpush.msrb.mxu0 %v560_v21 }
  0x38   :  { %254 = vmatpush.msrb.mxu2 %v552_v18  ;;  %276 = vmatpush.msrb.mxu3 %v552_v18 }
  0x39   :  { %233 = vmatpush.msrb.mxu1 %v560_v21  ;;  %300 = vmatpush.msrb.mxu0 %v565_v23 }
  0x3a   :  { %255 = vmatpush.msrb.mxu2 %v560_v21  ;;  %277 = vmatpush.msrb.mxu3 %v560_v21 }
  0x3b   :  { %234 = vmatpush.msrb.mxu1 %v565_v23  ;;  %301 = vmatpush.msrb.mxu0 %v569_v25 }
  0x3c   :  { %256 = vmatpush.msrb.mxu2 %v565_v23  ;;  %278 = vmatpush.msrb.mxu3 %v565_v23 }
  0x3d   :  { %235 = vmatpush.msrb.mxu1 %v569_v25  ;;  %302 = vmatpush.msrb.mxu0 %v574_v27 }
  0x3e   :  { %257 = vmatpush.msrb.mxu2 %v569_v25  ;;  %279 = vmatpush.msrb.mxu3 %v569_v25 }
  0x3f   :  { %236 = vmatpush.msrb.mxu1 %v574_v27  ;;  %303 = vmatpush.msrb.mxu0 %v579_v29 }
  0x40   :  { %258 = vmatpush.msrb.mxu2 %v574_v27  ;;  %280 = vmatpush.msrb.mxu3 %v574_v27 }
  0x41   :  { %237 = vmatpush.msrb.mxu1 %v579_v29  ;;  %304 = vmatpush.msrb.mxu0 %v584_v31 }
  0x42   :  { %259 = vmatpush.msrb.mxu2 %v579_v29  ;;  %281 = vmatpush.msrb.mxu3 %v579_v29 }
  0x43   :  { %238 = vmatpush.msrb.mxu1 %v584_v31  ;;  %305 = vmatpush.msrb.mxu0 %v589_v33 }
  0x44   :  { %260 = vmatpush.msrb.mxu2 %v584_v31  ;;  %282 = vmatpush.msrb.mxu3 %v584_v31 }
  0x45   :  { %239 = vmatpush.msrb.mxu1 %v589_v33  ;;  %306 = vmatpush.msrb.mxu0 %v594_v35 }
  0x46   :  { %261 = vmatpush.msrb.mxu2 %v589_v33  ;;  %283 = vmatpush.msrb.mxu3 %v589_v33 }
  0x47   :  { %240 = vmatpush.msrb.mxu1 %v594_v35  ;;  %307 = vmatpush.msrb.mxu0 %v605_v38 }
  0x48   :  { %262 = vmatpush.msrb.mxu2 %v594_v35  ;;  %284 = vmatpush.msrb.mxu3 %v594_v35 }
  0x49   :  { %241 = vmatpush.msrb.mxu1 %v605_v38  ;;  %308 = vmatpush.msrb.mxu0 %v608_v39 }
  0x4a   :  { %263 = vmatpush.msrb.mxu2 %v605_v38  ;;  %285 = vmatpush.msrb.mxu3 %v605_v38 }
  0x4b   :  { %242 = vmatpush.msrb.mxu1 %v608_v39  ;;  %60 = vperm.xlu1 %417, %v35_v56  }
  0x4c   :  { %264 = vmatpush.msrb.mxu2 %v608_v39  ;;  %286 = vmatpush.msrb.mxu3 %v608_v39 }
  0x4d   :  { %315 = vmatpush.msra.mxu1 %v523_v6 }
  0x4f   :  { %316 = vmatpush.msra.mxu1 %v525_v7 }
  0x51   :  { %317 = vmatpush.msra.mxu1 %v529_v9 }
  0x53   :  { %318 = vmatpush.msra.mxu1 %v545_v14 }
  0x55   :  { %319 = vmatpush.msra.mxu1 %v548_v16 }
  0x57   :  { %320 = vmatpush.msra.mxu1 %v552_v18 }
  0x59   :  { %321 = vmatpush.msra.mxu1 %v560_v21  ;;  %v351_v21 = vld [vmem:[#allocation2 + $0x178] sm:$0xff] }
  0x5b   :  { %322 = vmatpush.msra.mxu1 %v565_v23  ;;  %v349_v23 = vld [vmem:[#allocation2 + $0x168] sm:$0xff] }
  0x5d   :  { %323 = vmatpush.msra.mxu1 %v569_v25  ;;  %v348_v25 = vld [vmem:[#allocation2 + $0x160] sm:$0xff] }
  0x5f   :  { %324 = vmatpush.msra.mxu1 %v574_v27  ;;  %v346_v27 = vld [vmem:[#allocation2 + $0x150] sm:$0xff] }
  0x61   :  { %325 = vmatpush.msra.mxu1 %v579_v29 }
  0x63   :  { %v52_v48 = vpop.permute.xlu2 %51  ;;  %326 = vmatpush.msra.mxu1 %v584_v31  ;;  %v343_v31 = vld [vmem:[#allocation2 + $0x138] sm:$0xff] }
  0x64   :  { %vm66_vm4 = vcmp.eq.s32.totalorder %v663_v42, %v52_v48 }
  0x65   :  { %327 = vmatpush.msra.mxu1 %v589_v33 }
  0x67   :  { %328 = vmatpush.msra.mxu1 %v594_v35 }
  0x69   :  { %329 = vmatpush.msra.mxu1 %v605_v38  ;;  %v340_v38 = vld [vmem:[#allocation2 + $0x120] sm:$0xff] }
  0x6b   :  { %330 = vmatpush.msra.mxu1 %v608_v39  ;;  %v55_v49 = vpop.permute.xlu2 %54  ;;  %v339_v39 = vld [vmem:[#allocation2 + $0x118] sm:$0xff] }
  0x6c   :  { %vm67_vm5 = vcmp.eq.s32.totalorder %v663_v42, %v55_v49 }
  0x7a   :  { %v40_v43 = vpop.permute.xlu0 %39 }
  0x7b   :  { %vm62_vm0 = vcmp.eq.s32.totalorder %v663_v42, %v40_v43  ;;  %v46_v46 = vpop.permute.xlu1 %45 }
  0x7c   :  { %401 = vmatmul.msk.f32.vlgmr.msra.gmra.mxu0 %vm62_vm0, %v494_v44  ;;  %vm64_vm2 = vcmp.eq.s32.totalorder %v663_v42, %v46_v46  ;;  %v420_v46 = vld [vmem:[#allocation2 + $0x188] ss:$0 sm:$0xff] }
  0x82   :  { %v43_v45 = vpop.permute.xlu0 %42 }
  0x83   :  { %vm63_vm1 = vcmp.eq.s32.totalorder %v663_v42, %v43_v45  ;;  %v49_v47 = vpop.permute.xlu1 %48 }
  0x84   :  { %402 = vmatmul.msk.f32.gmra.mxu0 %vm63_vm1, %v494_v44  ;;  %vm65_vm3 = vcmp.eq.s32.totalorder %v663_v42, %v49_v47 }
  0x8a   :  { %v58_v50 = vpop.permute.xlu0 %57 }
  0x8b   :  { %vm68_vm6 = vcmp.eq.s32.totalorder %v663_v42, %v58_v50 }
  0x8c   :  { %403 = vmatmul.msk.f32.gmra.mxu0 %vm64_vm2, %v494_v44 }
  0x94   :  { %404 = vmatmul.msk.f32.gmra.mxu0 %vm65_vm3, %v494_v44 }
  0x9c   :  { %405 = vmatmul.msk.f32.gmra.mxu0 %vm66_vm4, %v494_v44 }
  0xa4   :  { %406 = vmatmul.msk.f32.gmra.mxu0 %vm67_vm5, %v494_v44 }
  0xa8   :  { %v178_v53 = vpop.f32.mrf.mxu1 }
  0xac   :  { %407 = vmatmul.msk.f32.gmra.mxu0 %vm68_vm6, %v494_v44 }
  0xbd   :  { %v61_v58 = vpop.permute.xlu1 %60 }
  0xbe   :  { %vm69_vm7 = vcmp.eq.s32.totalorder %v663_v42, %v61_v58 }
  0xbf   :  { %408 = vmatmul.msk.f32.gmra.mxu0 %vm69_vm7, %v494_v44 }
  0xf9   :  { %v121_v52 = vpop.f32.mrf.mxu0 }
  0xfa   :  { %v122_v54 = vadd.f32 %v704_v51, %v121_v52 }
  0xfc   :  { %v181_v55 = vadd.f32 %v178_v53, %v122_v54 }
  0xfe   :  { %421 = vtanh.f32 %v181_v55 }
 0x101   :  { %v124_v59 = vpop.f32.mrf.mxu0 }
 0x102   :  { %v125_v60 = vadd.f32 %v704_v51, %v124_v59 }
 0x104   :  { %v422_v57 = vpop.eup %421 }
 0x105   :  { %199 = vmatmul.f32.vlgmr.msra.gmra.mxu2 %v422_v57 }
 0x106   :  { %355 = vmatpush.msra.mxu2 %v352_v20 }
 0x108   :  { %356 = vmatpush.msra.mxu2 %v351_v21 }
 0x109   :  { %v127_v0 = vpop.f32.mrf.mxu0 }
 0x10a   :  { %v128_v1 = vadd.f32 %v704_v51, %v127_v0  ;;  %357 = vmatpush.msra.mxu2 %v350_v22 }
 0x10c   :  { %358 = vmatpush.msra.mxu2 %v349_v23 }
 0x10e   :  { %359 = vmatpush.msra.mxu2 %v348_v25 }
 0x110   :  { %360 = vmatpush.msra.mxu2 %v347_v26 }
 0x111   :  { %v130_v5 = vpop.f32.mrf.mxu0 }
 0x112   :  { %v131_v6 = vadd.f32 %v704_v51, %v130_v5  ;;  %361 = vmatpush.msra.mxu2 %v346_v27 }
 0x114   :  { %362 = vmatpush.msra.mxu2 %v345_v28 }
 0x116   :  { %363 = vmatpush.msra.mxu2 %v344_v30 }
 0x118   :  { %364 = vmatpush.msra.mxu2 %v343_v31 }
 0x119   :  { %v133_v10 = vpop.f32.mrf.mxu0 }
 0x11a   :  { %v134_v11 = vadd.f32 %v704_v51, %v133_v10  ;;  %365 = vmatpush.msra.mxu2 %v342_v32 }
 0x11c   :  { %366 = vmatpush.msra.mxu2 %v341_v37 }
 0x11e   :  { %367 = vmatpush.msra.mxu2 %v340_v38 }
 0x120   :  { %368 = vmatpush.msra.mxu2 %v339_v39 }
 0x121   :  { %v136_v15 = vpop.f32.mrf.mxu0 }
 0x122   :  { %v137_v16 = vadd.f32 %v704_v51, %v136_v15  ;;  %369 = vmatpush.msra.mxu2 %v338_v40 }
 0x124   :  { %370 = vmatpush.msra.mxu2 %v337_v41 }
 0x129   :  { %v139_v24 = vpop.f32.mrf.mxu0 }
 0x12a   :  { %v140_v33 = vadd.f32 %v704_v51, %v139_v24 }
 0x13c   :  { %v142_v29 = vpop.f32.mrf.mxu0 }
 0x13d   :  { %v143_v42 = vadd.f32 %v704_v51, %v142_v29 }
 0x188   :  { %v200_v61 = vpop.f32.mrf.mxu2 }
 0x189   :  { %v203_v62 = vadd.f32 %v200_v61, %v125_v60 }
 0x18b   :  { %423 = vtanh.f32 %v203_v62 }
 0x191   :  { %v424_v63 = vpop.eup %423 }
 0x192   :  { %221 = vmatmul.f32.vlgmr.msra.gmra.mxu3 %v424_v63 }
 0x215   :  { %v222_v2 = vpop.f32.mrf.mxu3 }
 0x216   :  { %v225_v3 = vadd.f32 %v222_v2, %v128_v1 }
 0x218   :  { %425 = vtanh.f32 %v225_v3 }
 0x21e   :  { %v426_v4 = vpop.eup %425 }
 0x21f   :  { %243 = vmatmul.f32.vlgmr.msrb.gmra.mxu1 %v426_v4 }
 0x29c   :  { %v244_v7 = vpop.f32.mrf.mxu1 }
 0x29d   :  { %v247_v8 = vadd.f32 %v244_v7, %v131_v6 }
 0x29f   :  { %427 = vtanh.f32 %v247_v8 }
 0x2a5   :  { %v428_v9 = vpop.eup %427 }
 0x2a6   :  { %265 = vmatmul.f32.vlgmr.msrb.gmra.mxu2 %v428_v9 }
 0x329   :  { %v266_v12 = vpop.f32.mrf.mxu2 }
 0x32a   :  { %v269_v13 = vadd.f32 %v266_v12, %v134_v11 }
 0x32c   :  { %429 = vtanh.f32 %v269_v13 }
 0x332   :  { %v430_v14 = vpop.eup %429 }
 0x333   :  { %287 = vmatmul.f32.vlgmr.msrb.gmra.mxu3 %v430_v14 }
 0x3b6   :  { %v288_v17 = vpop.f32.mrf.mxu3 }
 0x3b7   :  { %v291_v18 = vadd.f32 %v288_v17, %v137_v16 }
 0x3b9   :  { %431 = vtanh.f32 %v291_v18 }
 0x3bf   :  { %v432_v19 = vpop.eup %431 }
 0x3c0   :  { %309 = vmatmul.f32.vlgmr.msrb.gmra.mxu0 %v432_v19 }
 0x43d   :  { %v310_v34 = vpop.f32.mrf.mxu0 }
 0x43e   :  { %v313_v35 = vadd.f32 %v310_v34, %v140_v33 }
 0x440   :  { %433 = vtanh.f32 %v313_v35 }
 0x446   :  { %v434_v36 = vpop.eup %433 }
 0x447   :  { %331 = vmatmul.f32.vlgmr.msra.gmra.mxu1 %v434_v36 }
 0x4c4   :  { %v332_v43 = vpop.f32.mrf.mxu1 }
 0x4c5   :  { %v335_v44 = vadd.f32 %v332_v43, %v143_v42 }
 0x4c7   :  { %435 = vtanh.f32 %v335_v44 }
 0x4cd   :  { %v436_v45 = vpop.eup %435 }
 0x4ce   :  { %371 = vmatmul.f32.vlgmr.msra.gmra.mxu2 %v436_v45 }
 0x551   :  { %v372_v47 = vpop.f32.mrf.mxu2 }
 0x552   :  { %v373_v48 = vadd.f32 %v420_v46, %v372_v47 }
 0x554   :  { %375 = vst [vmem:[#allocation5] sm:$0xff] %v373_v48 }
 0x555   :  { %386 = dma.vmem_to_hbm [thread:$0]  %s382_s3, 128, %s384_s6, [#allocation4]  }
 0x556   :  { %487 = dma.done.wait [#allocation4], 128  }
 0x557   :  { %488 = vsyncadd [#allocation4], 4294967168 }
 0x558   :  { %391 = vsyncpa [#allocation3], 1 }
 0x559   :  { %392 = vsyncpa [#allocation4], 1 }

</bundles_post_ra>
